<compile_context>
chip_gen: v6e
topology: v6e:2x2x1
jax: 0.10.0
libtpu: 0.0.40
codegen_flags: <defaults>
</compile_context>

<pallas_src>
import functools

import numpy as np
import jax
import jax.numpy as jnp
from jax.experimental import pallas as pl
from jax.experimental.pallas import tpu as pltpu


@functools.lru_cache(maxsize=None)
def _centered_idft_mats(n, transpose=False):
    """(3, n, n) float32 stack [real, imag, real+imag] of the centered ortho IDFT.

    M is such that fftshift(ifft(ifftshift(x), norm="ortho")) == M @ x.
    Computed once per size on host and cached (no per-call device FFT setup).
    The third plane (real+imag) feeds the Gauss 3-mult complex product without
    any in-kernel loop-invariant adds.
    """
    eye = np.eye(n, dtype=np.complex128)
    m = np.fft.fftshift(
        np.fft.ifft(np.fft.ifftshift(eye, axes=0), axis=0, norm="ortho"),
        axes=0,
    )
    if transpose:
        m = m.T
    return jnp.asarray(
        np.stack([m.real, m.imag, m.real + m.imag]).astype(np.float32)
    )


def _make_rss_kernel(C, H, W, compute_dtype):
    def cdot(a, b):
        # MXU matmul in compute_dtype with f32 accumulation.
        return jnp.dot(a.astype(compute_dtype), b.astype(compute_dtype),
                       preferred_element_type=jnp.float32)

    def kernel(mh_ref, mw_ref, k_ref, out_ref):
        # mh_ref: (3, H, H)    [real, imag, real+imag] centered IDFT along H
        # mw_ref: (3, W, W)    [real, imag, real+imag] centered IDFT along W, transposed
        # k_ref : (2, C*H, W)  [real, imag] k-space, coils stacked along rows
        # out_ref: (H, W)
        kr = k_ref[0]
        ki = k_ref[1]
        br = mw_ref[0]
        bi = mw_ref[1]
        bs = mw_ref[2]

        # ---- Stage A: T = K @ M_W^T for ALL coils in one matmul -------------
        # Gauss 3-mult complex product (3 real matmuls instead of 4).
        p1 = cdot(kr, br)
        p2 = cdot(ki, bi)
        p3 = cdot(kr + ki, bs)
        tr = p1 - p2            # (C*H, W) real
        ti = p3 - p1 - p2       # (C*H, W) imag

        # ---- Stage B: img_c = M_H @ T_c, accumulate |img_c|^2 over coils ----
        ar = mh_ref[0]
        ai = mh_ref[1]
        asum = mh_ref[2]
        acc = jnp.zeros((H, W), jnp.float32)
        for c in range(C):      # static unroll over coils (C known at trace time)
            trc = tr[c * H:(c + 1) * H]
            tic = ti[c * H:(c + 1) * H]
            q1 = cdot(ar, trc)
            q2 = cdot(ai, tic)
            q3 = cdot(asum, trc + tic)
            ir = q1 - q2
            acc = acc + ir * ir          # interleaved |.|^2 accumulation keeps
            ii = q3 - q1 - q2            # fewer (H, W) temporaries live
            acc = acc + ii * ii
        out_ref[...] = jnp.sqrt(acc)

    return kernel


def rss_transform(x, *, compute_dtype=jnp.float32):
    """Pallas implementation of rssTransform.forward.

    x: dict with 'kspace_pre' of shape (B, C, H, W, 2) float32 (real/imag last).
    returns: (B, H, W) float32 root-sum-of-squares coil-combined image.
    compute_dtype: jnp.bfloat16 roughly doubles/triples MXU throughput on
      v6e/v7x (f32 accumulation is kept); keep float32 when ~1e-3 accuracy is
      required.
    """
    kspace = x["kspace_pre"]
    B, C, H, W, two = kspace.shape
    assert two == 2, "expected complex-as-last-dim layout (..., 2)"

    # One transpose pass over HBM (instead of two stride-2 slices). The size-2
    # complex axis becomes a leading dim, and coils are stacked along rows so
    # stage A is a single (C*H, W) @ (W, W) matmul per batch.
    k = jnp.transpose(kspace, (0, 4, 1, 2, 3)).reshape(B, 2, C * H, W)
    k = k.astype(compute_dtype)

    mh = _centered_idft_mats(H, False).astype(compute_dtype)     # (3, H, H)
    mwT = _centered_idft_mats(W, True).astype(compute_dtype)     # (3, W, W)

    kernel = _make_rss_kernel(C, H, W, compute_dtype)

    grid_spec = pltpu.PrefetchScalarGridSpec(
        num_scalar_prefetch=0,
        grid=(B,),
        in_specs=[
            pl.BlockSpec((3, H, H), lambda b: (0, 0, 0)),               # mh (constant index map)
            pl.BlockSpec((3, W, W), lambda b: (0, 0, 0)),               # mwT (constant index map)
            pl.BlockSpec((None, 2, C * H, W), lambda b: (b, 0, 0, 0)),  # k-space planes
        ],
        out_specs=pl.BlockSpec((None, H, W), lambda b: (b, 0, 0)),
    )

    # Raise the scoped VMEM limit only when the per-step footprint needs it
    # (v6e/v5e have 128 MiB physical; stay under v7x's 64 MiB where possible).
    # TODO(synk): for very large H, W on v7x add an output-row tile axis instead
    #             of relying on a bigger resident block.
    itemsize = jnp.dtype(compute_dtype).itemsize
    vmem_est = (
        2 * (2 * C * H * W) * itemsize          # k block (double buffered)
        + 2 * 3 * (H * H + W * W) * itemsize    # DFT matrices (double buffered)
        + 2 * H * W * 4                         # output block (double buffered)
        + 6 * C * H * W * 4                     # stage-A temporaries (f32)
        + 8 * H * W * 4                         # stage-B temporaries + acc
    )
    vmem_limit = None
    if vmem_est > 32 * 1024 * 1024:
        vmem_limit = int(min(vmem_est * 5 // 4, 96 * 1024 * 1024))

    out = pl.pallas_call(
        kernel,
        out_shape=jax.ShapeDtypeStruct((B, H, W), jnp.float32),
        grid_spec=grid_spec,
        compiler_params=pltpu.CompilerParams(
            dimension_semantics=("parallel",),
            vmem_limit_bytes=vmem_limit,
        ),
    )(mh, mwT, k)
    return out


if __name__ == "__main__":
    key = jax.random.PRNGKey(0)
    B, C, H, W = 2, 4, 16, 16
    kspace = jax.random.normal(key, (B, C, H, W, 2), dtype=jnp.float32)
    x = {"kspace_pre": kspace}

    out = rss_transform(x)
    out = jax.block_until_ready(out)

    # Reference (plain JAX): centered ifft2 (ortho) + coil RSS.
    kc = kspace[..., 0] + 1j * kspace[..., 1]
    img = jnp.fft.fftshift(
        jnp.fft.ifft2(jnp.fft.ifftshift(kc, axes=(2, 3)), axes=(2, 3), norm="ortho"),
        axes=(2, 3),
    )
    ref = jnp.sqrt(jnp.sum(jnp.abs(img) ** 2, axis=1))

    assert out.shape == (B, H, W)
    assert jnp.allclose(out, ref, atol=1e-3, rtol=1e-3), (
        float(jnp.max(jnp.abs(out - ref)))
    )
    print("KERNEL_OK")
</pallas_src>

<mosaic_0001>
module attributes {stable_mosaic.version = 11 : i64} {
  func.func @kernel(%arg0: i32, %arg1: memref<3x16x16xf32, #tpu.memory_space<vmem>>, %arg2: memref<3x16x16xf32, #tpu.memory_space<vmem>>, %arg3: memref<1x2x64x16xf32, #tpu.memory_space<vmem>>, %arg4: memref<1x16x16xf32, #tpu.memory_space<vmem>>) attributes {dimension_semantics = [#tpu.dimension_semantics<parallel>], iteration_bounds = array<i64: 2>, scalar_prefetch = 0 : i64, scratch_operands = 0 : i64, tpu.core_type = #tpu.core_type<tc>, window_params = [{pipeline_mode = #tpu.pipeline_mode<synchronous>, transform_indices = @transform_0, window_bounds = array<i64: 3, 16, 16>}, {pipeline_mode = #tpu.pipeline_mode<synchronous>, transform_indices = @transform_1, window_bounds = array<i64: 3, 16, 16>}, {transform_indices = @transform_2, window_bounds = array<i64: 1, 2, 64, 16>}, {transform_indices = @transform_3, window_bounds = array<i64: 1, 16, 16>}]} {
    %c0 = arith.constant 0 : index
    %c0_0 = arith.constant 0 : index
    %c0_1 = arith.constant 0 : index
    %c0_2 = arith.constant 0 : index
    %0 = vector.load %arg3[%c0, %c0_0, %c0_1, %c0_2] : memref<1x2x64x16xf32, #tpu.memory_space<vmem>>, vector<1x1x64x16xf32>
    %1 = vector.shape_cast %0 : vector<1x1x64x16xf32> to vector<64x16xf32>
    %c0_3 = arith.constant 0 : index
    %c1 = arith.constant 1 : index
    %c0_4 = arith.constant 0 : index
    %c0_5 = arith.constant 0 : index
    %2 = vector.load %arg3[%c0_3, %c1, %c0_4, %c0_5] : memref<1x2x64x16xf32, #tpu.memory_space<vmem>>, vector<1x1x64x16xf32>
    %3 = vector.shape_cast %2 : vector<1x1x64x16xf32> to vector<64x16xf32>
    %c0_6 = arith.constant 0 : index
    %c0_7 = arith.constant 0 : index
    %c0_8 = arith.constant 0 : index
    %4 = vector.load %arg2[%c0_6, %c0_7, %c0_8] : memref<3x16x16xf32, #tpu.memory_space<vmem>>, vector<1x16x16xf32>
    %5 = vector.shape_cast %4 : vector<1x16x16xf32> to vector<16x16xf32>
    %c1_9 = arith.constant 1 : index
    %c0_10 = arith.constant 0 : index
    %c0_11 = arith.constant 0 : index
    %6 = vector.load %arg2[%c1_9, %c0_10, %c0_11] : memref<3x16x16xf32, #tpu.memory_space<vmem>>, vector<1x16x16xf32>
    %7 = vector.shape_cast %6 : vector<1x16x16xf32> to vector<16x16xf32>
    %c2 = arith.constant 2 : index
    %c0_12 = arith.constant 0 : index
    %c0_13 = arith.constant 0 : index
    %8 = vector.load %arg2[%c2, %c0_12, %c0_13] : memref<3x16x16xf32, #tpu.memory_space<vmem>>, vector<1x16x16xf32>
    %9 = vector.shape_cast %8 : vector<1x16x16xf32> to vector<16x16xf32>
    %cst = arith.constant dense<0.000000e+00> : vector<64x16xf32>
    %10 = tpu.matmul %1, %5, %cst {dimension_numbers = #tpu.dot_dimension_numbers<[1], [0], [0], [1], [0, 0, 1, 1], [], []>} : vector<64x16xf32>, vector<16x16xf32>, vector<64x16xf32> -> vector<64x16xf32>
    %cst_14 = arith.constant dense<0.000000e+00> : vector<64x16xf32>
    %11 = tpu.matmul %3, %7, %cst_14 {dimension_numbers = #tpu.dot_dimension_numbers<[1], [0], [0], [1], [0, 0, 1, 1], [], []>} : vector<64x16xf32>, vector<16x16xf32>, vector<64x16xf32> -> vector<64x16xf32>
    %12 = arith.addf %1, %3 : vector<64x16xf32>
    %cst_15 = arith.constant dense<0.000000e+00> : vector<64x16xf32>
    %13 = tpu.matmul %12, %9, %cst_15 {dimension_numbers = #tpu.dot_dimension_numbers<[1], [0], [0], [1], [0, 0, 1, 1], [], []>} : vector<64x16xf32>, vector<16x16xf32>, vector<64x16xf32> -> vector<64x16xf32>
    %14 = arith.subf %10, %11 : vector<64x16xf32>
    %15 = arith.subf %13, %10 : vector<64x16xf32>
    %16 = arith.subf %15, %11 : vector<64x16xf32>
    %c0_16 = arith.constant 0 : index
    %c0_17 = arith.constant 0 : index
    %c0_18 = arith.constant 0 : index
    %17 = vector.load %arg1[%c0_16, %c0_17, %c0_18] : memref<3x16x16xf32, #tpu.memory_space<vmem>>, vector<1x16x16xf32>
    %18 = vector.shape_cast %17 : vector<1x16x16xf32> to vector<16x16xf32>
    %c1_19 = arith.constant 1 : index
    %c0_20 = arith.constant 0 : index
    %c0_21 = arith.constant 0 : index
    %19 = vector.load %arg1[%c1_19, %c0_20, %c0_21] : memref<3x16x16xf32, #tpu.memory_space<vmem>>, vector<1x16x16xf32>
    %20 = vector.shape_cast %19 : vector<1x16x16xf32> to vector<16x16xf32>
    %c2_22 = arith.constant 2 : index
    %c0_23 = arith.constant 0 : index
    %c0_24 = arith.constant 0 : index
    %21 = vector.load %arg1[%c2_22, %c0_23, %c0_24] : memref<3x16x16xf32, #tpu.memory_space<vmem>>, vector<1x16x16xf32>
    %22 = vector.shape_cast %21 : vector<1x16x16xf32> to vector<16x16xf32>
    %cst_25 = arith.constant 0.000000e+00 : f32
    %23 = vector.broadcast %cst_25 : f32 to vector<16x16xf32>
    %24 = vector.extract_strided_slice %14 {offsets = [0, 0], sizes = [16, 16], strides = [1, 1]} : vector<64x16xf32> to vector<16x16xf32>
    %25 = vector.extract_strided_slice %16 {offsets = [0, 0], sizes = [16, 16], strides = [1, 1]} : vector<64x16xf32> to vector<16x16xf32>
    %cst_26 = arith.constant dense<0.000000e+00> : vector<16x16xf32>
    %26 = tpu.matmul %18, %24, %cst_26 {dimension_numbers = #tpu.dot_dimension_numbers<[1], [0], [0], [1], [0, 0, 1, 1], [], []>} : vector<16x16xf32>, vector<16x16xf32>, vector<16x16xf32> -> vector<16x16xf32>
    %cst_27 = arith.constant dense<0.000000e+00> : vector<16x16xf32>
    %27 = tpu.matmul %20, %25, %cst_27 {dimension_numbers = #tpu.dot_dimension_numbers<[1], [0], [0], [1], [0, 0, 1, 1], [], []>} : vector<16x16xf32>, vector<16x16xf32>, vector<16x16xf32> -> vector<16x16xf32>
    %28 = arith.addf %24, %25 : vector<16x16xf32>
    %cst_28 = arith.constant dense<0.000000e+00> : vector<16x16xf32>
    %29 = tpu.matmul %22, %28, %cst_28 {dimension_numbers = #tpu.dot_dimension_numbers<[1], [0], [0], [1], [0, 0, 1, 1], [], []>} : vector<16x16xf32>, vector<16x16xf32>, vector<16x16xf32> -> vector<16x16xf32>
    %30 = arith.subf %26, %27 : vector<16x16xf32>
    %31 = arith.mulf %30, %30 : vector<16x16xf32>
    %32 = arith.addf %23, %31 : vector<16x16xf32>
    %33 = arith.subf %29, %26 : vector<16x16xf32>
    %34 = arith.subf %33, %27 : vector<16x16xf32>
    %35 = arith.mulf %34, %34 : vector<16x16xf32>
    %36 = arith.addf %32, %35 : vector<16x16xf32>
    %37 = vector.extract_strided_slice %14 {offsets = [16, 0], sizes = [16, 16], strides = [1, 1]} : vector<64x16xf32> to vector<16x16xf32>
    %38 = vector.extract_strided_slice %16 {offsets = [16, 0], sizes = [16, 16], strides = [1, 1]} : vector<64x16xf32> to vector<16x16xf32>
    %cst_29 = arith.constant dense<0.000000e+00> : vector<16x16xf32>
    %39 = tpu.matmul %18, %37, %cst_29 {dimension_numbers = #tpu.dot_dimension_numbers<[1], [0], [0], [1], [0, 0, 1, 1], [], []>} : vector<16x16xf32>, vector<16x16xf32>, vector<16x16xf32> -> vector<16x16xf32>
    %cst_30 = arith.constant dense<0.000000e+00> : vector<16x16xf32>
    %40 = tpu.matmul %20, %38, %cst_30 {dimension_numbers = #tpu.dot_dimension_numbers<[1], [0], [0], [1], [0, 0, 1, 1], [], []>} : vector<16x16xf32>, vector<16x16xf32>, vector<16x16xf32> -> vector<16x16xf32>
    %41 = arith.addf %37, %38 : vector<16x16xf32>
    %cst_31 = arith.constant dense<0.000000e+00> : vector<16x16xf32>
    %42 = tpu.matmul %22, %41, %cst_31 {dimension_numbers = #tpu.dot_dimension_numbers<[1], [0], [0], [1], [0, 0, 1, 1], [], []>} : vector<16x16xf32>, vector<16x16xf32>, vector<16x16xf32> -> vector<16x16xf32>
    %43 = arith.subf %39, %40 : vector<16x16xf32>
    %44 = arith.mulf %43, %43 : vector<16x16xf32>
    %45 = arith.addf %36, %44 : vector<16x16xf32>
    %46 = arith.subf %42, %39 : vector<16x16xf32>
    %47 = arith.subf %46, %40 : vector<16x16xf32>
    %48 = arith.mulf %47, %47 : vector<16x16xf32>
    %49 = arith.addf %45, %48 : vector<16x16xf32>
    %50 = vector.extract_strided_slice %14 {offsets = [32, 0], sizes = [16, 16], strides = [1, 1]} : vector<64x16xf32> to vector<16x16xf32>
    %51 = vector.extract_strided_slice %16 {offsets = [32, 0], sizes = [16, 16], strides = [1, 1]} : vector<64x16xf32> to vector<16x16xf32>
    %cst_32 = arith.constant dense<0.000000e+00> : vector<16x16xf32>
    %52 = tpu.matmul %18, %50, %cst_32 {dimension_numbers = #tpu.dot_dimension_numbers<[1], [0], [0], [1], [0, 0, 1, 1], [], []>} : vector<16x16xf32>, vector<16x16xf32>, vector<16x16xf32> -> vector<16x16xf32>
    %cst_33 = arith.constant dense<0.000000e+00> : vector<16x16xf32>
    %53 = tpu.matmul %20, %51, %cst_33 {dimension_numbers = #tpu.dot_dimension_numbers<[1], [0], [0], [1], [0, 0, 1, 1], [], []>} : vector<16x16xf32>, vector<16x16xf32>, vector<16x16xf32> -> vector<16x16xf32>
    %54 = arith.addf %50, %51 : vector<16x16xf32>
    %cst_34 = arith.constant dense<0.000000e+00> : vector<16x16xf32>
    %55 = tpu.matmul %22, %54, %cst_34 {dimension_numbers = #tpu.dot_dimension_numbers<[1], [0], [0], [1], [0, 0, 1, 1], [], []>} : vector<16x16xf32>, vector<16x16xf32>, vector<16x16xf32> -> vector<16x16xf32>
    %56 = arith.subf %52, %53 : vector<16x16xf32>
    %57 = arith.mulf %56, %56 : vector<16x16xf32>
    %58 = arith.addf %49, %57 : vector<16x16xf32>
    %59 = arith.subf %55, %52 : vector<16x16xf32>
    %60 = arith.subf %59, %53 : vector<16x16xf32>
    %61 = arith.mulf %60, %60 : vector<16x16xf32>
    %62 = arith.addf %58, %61 : vector<16x16xf32>
    %63 = vector.extract_strided_slice %14 {offsets = [48, 0], sizes = [16, 16], strides = [1, 1]} : vector<64x16xf32> to vector<16x16xf32>
    %64 = vector.extract_strided_slice %16 {offsets = [48, 0], sizes = [16, 16], strides = [1, 1]} : vector<64x16xf32> to vector<16x16xf32>
    %cst_35 = arith.constant dense<0.000000e+00> : vector<16x16xf32>
    %65 = tpu.matmul %18, %63, %cst_35 {dimension_numbers = #tpu.dot_dimension_numbers<[1], [0], [0], [1], [0, 0, 1, 1], [], []>} : vector<16x16xf32>, vector<16x16xf32>, vector<16x16xf32> -> vector<16x16xf32>
    %cst_36 = arith.constant dense<0.000000e+00> : vector<16x16xf32>
    %66 = tpu.matmul %20, %64, %cst_36 {dimension_numbers = #tpu.dot_dimension_numbers<[1], [0], [0], [1], [0, 0, 1, 1], [], []>} : vector<16x16xf32>, vector<16x16xf32>, vector<16x16xf32> -> vector<16x16xf32>
    %67 = arith.addf %63, %64 : vector<16x16xf32>
    %cst_37 = arith.constant dense<0.000000e+00> : vector<16x16xf32>
    %68 = tpu.matmul %22, %67, %cst_37 {dimension_numbers = #tpu.dot_dimension_numbers<[1], [0], [0], [1], [0, 0, 1, 1], [], []>} : vector<16x16xf32>, vector<16x16xf32>, vector<16x16xf32> -> vector<16x16xf32>
    %69 = arith.subf %65, %66 : vector<16x16xf32>
    %70 = arith.mulf %69, %69 : vector<16x16xf32>
    %71 = arith.addf %62, %70 : vector<16x16xf32>
    %72 = arith.subf %68, %65 : vector<16x16xf32>
    %73 = arith.subf %72, %66 : vector<16x16xf32>
    %74 = arith.mulf %73, %73 : vector<16x16xf32>
    %75 = arith.addf %71, %74 : vector<16x16xf32>
    %76 = math.sqrt %75 : vector<16x16xf32>
    %c0_38 = arith.constant 0 : index
    %c0_39 = arith.constant 0 : index
    %c0_40 = arith.constant 0 : index
    %77 = vector.load %arg4[%c0_38, %c0_39, %c0_40] : memref<1x16x16xf32, #tpu.memory_space<vmem>>, vector<1x16x16xf32>
    %78 = vector.shape_cast %77 : vector<1x16x16xf32> to vector<16x16xf32>
    %79 = vector.shape_cast %76 : vector<16x16xf32> to vector<1x16x16xf32>
    tpu.vector_store %arg4[%c0_38, %c0_39, %c0_40], %79 {strides = array<i32>} : memref<1x16x16xf32, #tpu.memory_space<vmem>>, vector<1x16x16xf32>,
    return
  }
  func.func @transform_0(%arg0: i32) -> (i32, i32, i32) {
    %c0_i32 = arith.constant 0 : i32
    %c0_i32_0 = arith.constant 0 : i32
    %c0_i32_1 = arith.constant 0 : i32
    %c0_i32_2 = arith.constant 0 : i32
    return %c0_i32, %c0_i32_0, %c0_i32_1 : i32, i32, i32
  }
  func.func @transform_1(%arg0: i32) -> (i32, i32, i32) {
    %c0_i32 = arith.constant 0 : i32
    %c0_i32_0 = arith.constant 0 : i32
    %c0_i32_1 = arith.constant 0 : i32
    %c0_i32_2 = arith.constant 0 : i32
    return %c0_i32, %c0_i32_0, %c0_i32_1 : i32, i32, i32
  }
  func.func @transform_2(%arg0: i32) -> (i32, i32, i32, i32) {
    %c0_i32 = arith.constant 0 : i32
    %c0_i32_0 = arith.constant 0 : i32
    %c0_i32_1 = arith.constant 0 : i32
    %c0_i32_2 = arith.constant 0 : i32
    return %arg0, %c0_i32, %c0_i32_0, %c0_i32_1 : i32, i32, i32, i32
  }
  func.func @transform_3(%arg0: i32) -> (i32, i32, i32) {
    %c0_i32 = arith.constant 0 : i32
    %c0_i32_0 = arith.constant 0 : i32
    %c0_i32_1 = arith.constant 0 : i32
    return %arg0, %c0_i32, %c0_i32_0 : i32, i32, i32
  }
}

</mosaic_0001>

<bundles_post_ra>
// kernel: tpu_custom_call.1
= control target key start
LH: loop header
LB: loop body
LE: loop exit
PB: predicated region body
PF: predicated region fallthrough
CT: control target
= control target key end

     0   :  { %8 = vsyncpa [#allocation3], 0  ;;  %s2364_s0 = inlined_call_operand.vmem [shape: f32[3,16,16], index: 0, kind: input, shape index: {}]   ;;  %s2365_s1 = inlined_call_operand.vmem [shape: f32[3,16,16], index: 1, kind: input, shape index: {}]   ;;  %s2366_s2 = inlined_call_operand.vmem [shape: f32[2,2,64,16], index: 2, kind: input, shape index: {}]   ;;  %s2367_s3 = inlined_call_operand.hbm [shape: f32[2,16,16], index: 3, kind: output, shape index: {}]  }
   0x1   :  { %10 = vsyncpa [#allocation3 + $0x1], 0  ;;  %s2114_s12 = smov 0   ;;  %s2116_s13 = smov 0  }
   0x2   :  { %s2118_s14 = smov 0   ;;  %s2120_s15 = smov 0  }
   0x3 LB: > { %s2135_s16 = sadd.s32 4294967295, %s2089_s15   ;;  %s1696_s17 = sadd.s32 4294967294, %s2089_s15   ;;  %s2089_s15 = sphi %s2120_s15, %s2373_s15   ;;  %s2085_s14 = sphi %s2118_s14, %s2372_s14   ;;  %s2081_s13 = sphi %s2116_s13, %s2371_s13   ;;  %s2077_s12 = sphi %s2114_s12, %s2370_s12  }
   0x4   : > { %s2139_s18 = sadd.s32 1, %s2089_s15   ;;  %s91_s19 = sadd.s32 1, %s2085_s14 }
   0x5   : > { %s88_s20 = ssub.s32 %s2089_s15, %s2139_s18  ;;  %p101_p0 = scmp.ne.s32.totalorder %s2085_s14, %s2081_s13 }
   0x6   : > { %p89_p1 = scmp.eq.s32.totalorder %s88_s20, 0  ;;  %p102_p2 = scmp.eq.s32.totalorder %s2135_s16, 1 }
   0x7   : > { %p107_p3 = scmp.ne.s32.totalorder %s2081_s13, %s2077_s12  ;;  %p108_p4 = scmp.eq.s32.totalorder %s1696_s17, 1 }
   0x8   : > { %s2150_s21 = scalar_select %p89_p1, %s2085_s14, %s91_s19  }
   0x9   : > { %p2152_p5 = por %p102_p2, %p101_p0  ;;  %p2156_p6 = por %p108_p4, %p107_p3 }
   0xa   : > { %p1699_p7 = scmp.ge.s32.totalorder %s2089_s15, 1  ;;  %p140_p8 = scmp.lt.s32.totalorder %s2089_s15, 3 }
   0xc   : > { %p141_p9 = pnand %p1699_p7, %p140_p8 }
   0xd   : > { %p164_p10 = scmp.lt.s32.totalorder (!%p141_p9), %s2135_s16, 1  ;;  %s1773_s10 = sshll.u32 (!%p141_p9), %s2135_s16, 8 }
   0xe   : > { %144 = sbr.rel (%p141_p9) target bundleno = 508 (0x1fc), region = 32  ;;  %s2318_s24 = scalar_lea.hbm (!%p141_p9), %s2367_s3, %s1773_s10 }
   0xf   : > { %s2091_s26 = smov (!%p141_p9), [#allocation2]  }
  0x10   : > { %s2033_s27 = sshll.u32 (!%p141_p9), %s2091_s26, 4  ;;  %s2034_s27 = int_to_ptr.vmem [resolvable:$false] %s2033_s27 }
  0x11   : > { %s2035_s28 = scalar_lea.vmem (!%p141_p9), %s2034_s27, 512 }
  0x13   : > { %v187_v0 = vld [vmem:[%s2365_s1 + $0x8] sm:$0xff]  ;;  %v1712_v1 = vld [vmem:[%s2365_s1 + $0x18] sm:$0xff]  ;;  %v186_v2 = vld [vmem:[%s2365_s1] sm:$0xff]  ;;  %s165_s5 = scalar_select %p164_p10, %s2135_s16, 1  ;;  %vm194_vm0 = vcmask 130048  }
  0x14   : > { %1852 = vmatprep.subr.mxu0 %v187_v0  ;;  %1868 = vmatprep.subr.mxu1 %v1712_v1  ;;  %v1711_v3 = vld [vmem:[%s2365_s1 + $0x10] sm:$0xff]  ;;  %v1714_v4 = vld [vmem:[%s2365_s1 + $0x28] sm:$0xff]  ;;  %v1713_v11 = vld [vmem:[%s2365_s1 + $0x20] sm:$0xff] }
  0x15   : > { %1853 = vmatpush3.msra.mxu0 %v187_v0  ;;  %1869 = vmatpush3.msra.mxu1 %v1712_v1  ;;  %s1772_s8 = sshll.u32 %s165_s5, 7  ;;  %v2230_v30 = vld [vmem:[%s2364_s0] sm:$0xff]  ;;  %v2237_v31 = vld [vmem:[%s2364_s0 + $0x10] sm:$0xff]  ;;  %v2244_v39 = vld [vmem:[%s2364_s0 + $0x8] sm:$0xff] }
  0x16   : > { %1854 = vmatprep.subr.mxu0 %v186_v2  ;;  %1870 = vmatprep.subr.mxu1 %v1711_v3  ;;  %s2182_s11 = scalar_lea.vmem %s2366_s2, %s1772_s8  ;;  %v2257_v56 = vld [vmem:[%s2364_s0 + $0x18] sm:$0xff]  ;;  %v2264_v0 = vld [vmem:[%s2364_s0 + $0x20] sm:$0xff]  ;;  %s161_s8 = sand.u32 1, %s2081_s13  }
  0x17   : > { %1855 = vmatpush3.msra.mxu0 %v186_v2  ;;  %1871 = vmatpush3.msra.mxu1 %v1711_v3  ;;  %v169_v5 = vld [vmem:[%s2182_s11] sm:$0xff]  ;;  %v170_v7 = vld [vmem:[%s2182_s11 + $0x8] sm:$0xff]  ;;  %v171_v9 = vld [vmem:[%s2182_s11 + $0x10] sm:$0xff]  ;;  %s1700_s9 = sshll.u32 %s161_s8, 4  ;;  %s2324_s16 = scalar_lea.sflag [#allocation3], %s161_s8 }
  0x18   : > { %1884 = vmatprep.subr.mxu0 %v1714_v4  ;;  %v1703_v6 = vld [vmem:[%s2182_s11 + $0x40] sm:$0xff]  ;;  %1856 = vmatprep.mubr.msk.f32.mxu0 %vm194_vm0, %v169_v5  ;;  %v1704_v8 = vld [vmem:[%s2182_s11 + $0x48] sm:$0xff]  ;;  %v1705_v10 = vld [vmem:[%s2182_s11 + $0x50] sm:$0xff] }
  0x19   : > { %1872 = vmatprep.mubr.msk.f32.mxu1 %vm194_vm0, %v1703_v6  ;;  %1857 = vmatmul.mubr.msk.f32.vlgmr.msra.gmra.mxu0 %vm194_vm0, %v170_v7  ;;  %v172_v12 = vld [vmem:[%s2182_s11 + $0x18] sm:$0xff]  ;;  %v173_v14 = vld [vmem:[%s2182_s11 + $0x20] sm:$0xff]  ;;  %v174_v16 = vld [vmem:[%s2182_s11 + $0x28] sm:$0xff]  ;;  %v453_v20 = vadd.f32 %v1703_v6, %v169_v5  ;;  %v454_v23 = vadd.f32 %v1704_v8, %v170_v7  ;;  %v455_v24 = vadd.f32 %v1705_v10, %v171_v9 }
  0x1a   : > { %1873 = vmatmul.mubr.msk.f32.vlgmr.msra.gmra.mxu1 %vm194_vm0, %v1704_v8  ;;  %1859 = vmatprep.mubr.msk.f32.mxu0 %vm194_vm0, %v171_v9  ;;  %v1706_v13 = vld [vmem:[%s2182_s11 + $0x58] sm:$0xff]  ;;  %v1707_v15 = vld [vmem:[%s2182_s11 + $0x60] sm:$0xff]  ;;  %v1708_v17 = vld [vmem:[%s2182_s11 + $0x68] sm:$0xff] }
  0x1b   : > { %1875 = vmatprep.mubr.msk.f32.mxu1 %vm194_vm0, %v1705_v10  ;;  %1885 = vmatpush3.msra.mxu0 %v1714_v4  ;;  %v175_v18 = vld [vmem:[%s2182_s11 + $0x30] sm:$0xff]  ;;  %v176_v21 = vld [vmem:[%s2182_s11 + $0x38] sm:$0xff]  ;;  %v456_v25 = vadd.f32 %v1706_v13, %v172_v12  ;;  %v457_v26 = vadd.f32 %v1707_v15, %v173_v14  ;;  %v458_v27 = vadd.f32 %v1708_v17, %v174_v16  ;;  %v2269_v3 = vld [vmem:[%s2364_s0 + $0x28] sm:$0xff] }
  0x1c   : > { %1886 = vmatprep.subr.mxu0 %v1713_v11  ;;  %v1709_v19 = vld [vmem:[%s2182_s11 + $0x70] sm:$0xff]  ;;  %v1710_v22 = vld [vmem:[%s2182_s11 + $0x78] sm:$0xff]  ;;  %s163_s11 = scalar_lea.vmem [#allocation2], %s1700_s9 }
  0x1d   : > { %1860 = vmatmul.mubr.msk.f32.gmra.mxu0 %vm194_vm0, %v172_v12  ;;  %v459_v28 = vadd.f32 %v1709_v19, %v175_v18  ;;  %v460_v29 = vadd.f32 %v1710_v22, %v176_v21  ;;  %s1634_s17 = sshll.u32 %s163_s11, 4  ;;  %s2320_s17 = int_to_ptr.vmem [resolvable:$true] %s1634_s17 }
  0x1e   : > { %1876 = vmatmul.mubr.msk.f32.gmra.mxu1 %vm194_vm0, %v1706_v13  ;;  %1862 = vmatprep.mubr.msk.f32.mxu0 %vm194_vm0, %v173_v14  ;;  %s2029_s25 = scalar_lea.vmem %s2320_s17, 256  ;;  %p2036_p0 = scmp.lt.s32.totalorder %s2320_s17, %s2034_s27 }
  0x1f   : > { %1878 = vmatprep.mubr.msk.f32.mxu1 %vm194_vm0, %v1707_v15  ;;  %1887 = vmatpush3.msra.mxu0 %v1713_v11  ;;  %p2030_p11 = scmp.ne.s32.totalorder %s2320_s17, %s2029_s25  ;;  %p2037_p1 = scmp.lt.s32.totalorder %s2035_s28, %s2029_s25 }
  0x21   : > { %1863 = vmatmul.mubr.msk.f32.gmra.mxu0 %vm194_vm0, %v174_v16  ;;  %p2031_p12 = pnand %p2030_p11, %p2152_p5  ;;  %p2038_p2 = por %p2037_p1, %p2036_p0 }
  0x22   : > { %1879 = vmatmul.mubr.msk.f32.gmra.mxu1 %vm194_vm0, %v1708_v17  ;;  %1865 = vmatprep.mubr.msk.f32.mxu0 %vm194_vm0, %v175_v18 }
  0x23   : > { %1881 = vmatprep.mubr.msk.f32.mxu1 %vm194_vm0, %v1709_v19  ;;  %p2032_p13 = pneg %p2031_p12 }
  0x25   : > { %1866 = vmatmul.mubr.msk.f32.gmra.mxu0 %vm194_vm0, %v176_v21  ;;  %p2039_p3 = pnand %p2038_p2, %p2032_p13 }
  0x26   : > { %1882 = vmatmul.mubr.msk.f32.gmra.mxu1 %vm194_vm0, %v1710_v22  ;;  %1888 = vmatprep.mubr.msk.f32.mxu0 %vm194_vm0, %v453_v20 }
  0x27   : > { %1904 = vmatprep.mubr.msk.f32.mxu1 %vm194_vm0, %v2230_v30 }
  0x29   : > { %1889 = vmatmul.mubr.msk.f32.vlgmr.msra.gmra.mxu0 %vm194_vm0, %v454_v23 }
  0x2a   : > { %1891 = vmatprep.mubr.msk.f32.mxu0 %vm194_vm0, %v455_v24 }
  0x2d   : > { %1892 = vmatmul.mubr.msk.f32.gmra.mxu0 %vm194_vm0, %v456_v25 }
  0x2e   : > { %1894 = vmatprep.mubr.msk.f32.mxu0 %vm194_vm0, %v457_v26 }
  0x31   : > { %1895 = vmatmul.mubr.msk.f32.gmra.mxu0 %vm194_vm0, %v458_v27 }
  0x32   : > { %1897 = vmatprep.mubr.msk.f32.mxu0 %vm194_vm0, %v459_v28 }
  0x35   : > { %1898 = vmatmul.mubr.msk.f32.gmra.mxu0 %vm194_vm0, %v460_v29 }
  0x36   : > { %1932 = vmatprep.mubr.msk.f32.mxu0 %vm194_vm0, %v2237_v31 }
  0xd9   : > { %v1858_v32 = vpop.f32.mrf.mxu0 }
  0xda   : > { %v1874_v33 = vpop.f32.mrf.mxu1 }
  0xdb   : > { %v591_v34 = vsub.f32 %v1858_v32, %v1874_v33  ;;  %v285_v35 = vpop.f32.mrf.mxu0 }
  0xdc   : > { %v414_v36 = vpop.f32.mrf.mxu1 }
  0xdd   : > { %v590_v37 = vsub.f32 %v285_v35, %v414_v36  ;;  %1900 = vmatprep.subr.mxu1 %v591_v34  ;;  %v1861_v38 = vpop.f32.mrf.mxu0 }
  0xde   : > { %1901 = vmatpush3.msra.mxu1 %v591_v34  ;;  %v1877_v46 = vpop.f32.mrf.mxu1 }
  0xdf   : > { %1902 = vmatprep.subr.mxu1 %v590_v37  ;;  %v295_v40 = vpop.f32.mrf.mxu0  ;;  %v593_v4 = vsub.f32 %v1861_v38, %v1877_v46 }
  0xe0   : > { %1903 = vmatpush3.msra.mxu1 %v590_v37  ;;  %v424_v52 = vpop.f32.mrf.mxu1 }
  0xe1   : > { %1905 = vmatmul.mubr.msk.f32.vlgmr.msra.gmra.mxu1 %vm194_vm0, %v2244_v39  ;;  %v1864_v41 = vpop.f32.mrf.mxu0  ;;  %v592_v7 = vsub.f32 %v295_v40, %v424_v52 }
  0xe2   : > { %1911 = vmatprep.mubr.msk.f32.mxu1 %vm194_vm0, %v2237_v31  ;;  %v1880_v61 = vpop.f32.mrf.mxu1 }
  0xe3   : > { %v305_v42 = vpop.f32.mrf.mxu0  ;;  %v595_v5 = vsub.f32 %v1864_v41, %v1880_v61 }
  0xe4   : > { %v434_v6 = vpop.f32.mrf.mxu1 }
  0xe5   : > { %v2250_v43 = vpop.f32.mrf.mxu0  ;;  %v594_v10 = vsub.f32 %v305_v42, %v434_v6 }
  0xe6   : > { %v1883_v19 = vpop.f32.mrf.mxu1 }
  0xe7   : > { %v2252_v44 = vpop.f32.mrf.mxu0  ;;  %v597_v24 = vsub.f32 %v2250_v43, %v1883_v19 }
  0xe8   : > { %v444_v22 = vpop.f32.mrf.mxu1 }
  0xe9   : > { %v1890_v45 = vpop.f32.mrf.mxu0  ;;  %v596_v25 = vsub.f32 %v2252_v44, %v444_v22 }
  0xea   : > { %v599_v47 = vsub.f32 %v1890_v45, %v1858_v32 }
  0xeb   : > { %v551_v48 = vpop.f32.mrf.mxu0 }
  0xec   : > { %v607_v49 = vsub.f32 %v599_v47, %v1874_v33  ;;  %v598_v50 = vsub.f32 %v551_v48, %v285_v35 }
  0xed   : > { %v1893_v51 = vpop.f32.mrf.mxu0 }
  0xee   : > { %v606_v53 = vsub.f32 %v598_v50, %v414_v36  ;;  %v601_v54 = vsub.f32 %v1893_v51, %v1861_v38  ;;  %1907 = vmatprep.subr.mxu1 %v607_v49  ;;  %v785_v59 = vadd.f32 %v607_v49, %v591_v34 }
  0xef   : > { %v561_v55 = vpop.f32.mrf.mxu0  ;;  %1908 = vmatpush3.msra.mxu1 %v607_v49 }
  0xf0   : > { %v609_v57 = vsub.f32 %v601_v54, %v1877_v46  ;;  %v600_v58 = vsub.f32 %v561_v55, %v295_v40  ;;  %1909 = vmatprep.subr.mxu1 %v606_v53  ;;  %v784_v63 = vadd.f32 %v606_v53, %v590_v37 }
  0xf1   : > { %v1896_v60 = vpop.f32.mrf.mxu0  ;;  %1910 = vmatpush3.msra.mxu1 %v606_v53 }
  0xf2   : > { %v608_v62 = vsub.f32 %v600_v58, %v424_v52  ;;  %1912 = vmatmul.mubr.msk.f32.vlgmr.msra.gmra.mxu1 %vm194_vm0, %v2257_v56  ;;  %1914 = vmatprep.subr.mxu1 %v785_v59  ;;  %v603_v1 = vsub.f32 %v1896_v60, %v1864_v41  ;;  %v1032_v13 = vadd.f32 %v609_v57, %v593_v4 }
  0xf3   : > { %1928 = vmatprep.subr.mxu0 %v609_v57  ;;  %1915 = vmatpush3.msra.mxu1 %v785_v59  ;;  %v571_v2 = vpop.f32.mrf.mxu0 }
  0xf4   : > { %1929 = vmatpush3.msra.mxu0 %v609_v57  ;;  %1916 = vmatprep.subr.mxu1 %v784_v63  ;;  %v602_v8 = vsub.f32 %v571_v2, %v305_v42  ;;  %v611_v9 = vsub.f32 %v603_v1, %v1880_v61  ;;  %v1031_v15 = vadd.f32 %v608_v62, %v592_v7 }
  0xf5   : > { %1930 = vmatprep.subr.mxu0 %v608_v62  ;;  %1917 = vmatpush3.msra.mxu1 %v784_v63  ;;  %v1899_v11 = vpop.f32.mrf.mxu0 }
  0xf6   : > { %1918 = vmatprep.mubr.msk.f32.mxu1 %vm194_vm0, %v2264_v0  ;;  %1931 = vmatpush3.msra.mxu0 %v608_v62  ;;  %v610_v12 = vsub.f32 %v602_v8, %v434_v6  ;;  %v1273_v14 = vadd.f32 %v611_v9, %v595_v5  ;;  %v605_v16 = vsub.f32 %v1899_v11, %v2250_v43 }
  0xf7   : > { %1919 = vmatmul.mubr.msk.f32.vlgmr.msra.gmra.mxu1 %vm194_vm0, %v2269_v3  ;;  %1921 = vmatprep.subr.mxu1 %v593_v4  ;;  %v581_v17 = vpop.f32.mrf.mxu0 }
  0xf8   : > { %1942 = vmatprep.subr.mxu0 %v595_v5  ;;  %1922 = vmatpush3.msra.mxu1 %v593_v4  ;;  %v1272_v18 = vadd.f32 %v610_v12, %v594_v10  ;;  %v604_v20 = vsub.f32 %v581_v17, %v2252_v44  ;;  %v613_v21 = vsub.f32 %v605_v16, %v1883_v19 }
  0xf9   : > { %1933 = vmatmul.mubr.msk.f32.vlgmr.msra.gmra.mxu0 %vm194_vm0, %v2257_v56  ;;  %1923 = vmatprep.subr.mxu1 %v592_v7 }
  0xfa   : > { %1943 = vmatpush3.msra.mxu0 %v595_v5  ;;  %1924 = vmatpush3.msra.mxu1 %v592_v7  ;;  %v612_v23 = vsub.f32 %v604_v20, %v444_v22  ;;  %v1514_v26 = vadd.f32 %v613_v21, %v597_v24 }
  0xfb   : > { %1944 = vmatprep.subr.mxu0 %v594_v10  ;;  %1925 = vmatprep.mubr.msk.f32.mxu1 %vm194_vm0, %v2230_v30 }
  0xfc   : > { %1945 = vmatpush3.msra.mxu0 %v594_v10  ;;  %1926 = vmatmul.mubr.msk.f32.vlgmr.msra.gmra.mxu1 %vm194_vm0, %v2244_v39  ;;  %v1513_v27 = vadd.f32 %v612_v23, %v596_v25 }
  0xfd   : > { %1935 = vmatprep.subr.mxu1 %v1032_v13  ;;  %1946 = vmatprep.mubr.msk.f32.mxu0 %vm194_vm0, %v2230_v30 }
  0xfe   : > { %1956 = vmatprep.subr.mxu0 %v1273_v14  ;;  %1936 = vmatpush3.msra.mxu1 %v1032_v13 }
  0xff   : > { %1947 = vmatmul.mubr.msk.f32.vlgmr.msra.gmra.mxu0 %vm194_vm0, %v2244_v39  ;;  %1937 = vmatprep.subr.mxu1 %v1031_v15 }
 0x100   : > { %1957 = vmatpush3.msra.mxu0 %v1273_v14  ;;  %1938 = vmatpush3.msra.mxu1 %v1031_v15 }
 0x101   : > { %1958 = vmatprep.subr.mxu0 %v1272_v18  ;;  %1939 = vmatprep.mubr.msk.f32.mxu1 %vm194_vm0, %v2264_v0 }
 0x102   : > { %1959 = vmatpush3.msra.mxu0 %v1272_v18  ;;  %1940 = vmatmul.mubr.msk.f32.vlgmr.msra.gmra.mxu1 %vm194_vm0, %v2269_v3 }
 0x103   : > { %1949 = vmatprep.subr.mxu1 %v611_v9  ;;  %1960 = vmatprep.mubr.msk.f32.mxu0 %vm194_vm0, %v2264_v0 }
 0x104   : > { %1970 = vmatprep.subr.mxu0 %v613_v21  ;;  %1950 = vmatpush3.msra.mxu1 %v611_v9 }
 0x105   : > { %1961 = vmatmul.mubr.msk.f32.vlgmr.msra.gmra.mxu0 %vm194_vm0, %v2269_v3  ;;  %1951 = vmatprep.subr.mxu1 %v610_v12 }
 0x106   : > { %1971 = vmatpush3.msra.mxu0 %v613_v21  ;;  %1952 = vmatpush3.msra.mxu1 %v610_v12 }
 0x107   : > { %1972 = vmatprep.subr.mxu0 %v612_v23  ;;  %1953 = vmatprep.mubr.msk.f32.mxu1 %vm194_vm0, %v2237_v31 }
 0x108   : > { %1973 = vmatpush3.msra.mxu0 %v612_v23  ;;  %1954 = vmatmul.mubr.msk.f32.vlgmr.msra.gmra.mxu1 %vm194_vm0, %v2257_v56 }
 0x109   : > { %1963 = vmatprep.subr.mxu1 %v597_v24  ;;  %1967 = vmatprep.mubr.msk.f32.mxu1 %vm194_vm0, %v2230_v30 }
 0x10a   : > { %1964 = vmatpush3.msra.mxu1 %v597_v24  ;;  %1974 = vmatprep.mubr.msk.f32.mxu0 %vm194_vm0, %v2237_v31 }
 0x10b   : > { %1965 = vmatprep.subr.mxu1 %v596_v25  ;;  %1975 = vmatmul.mubr.msk.f32.vlgmr.msra.gmra.mxu0 %vm194_vm0, %v2257_v56 }
 0x10c   : > { %1966 = vmatpush3.msra.mxu1 %v596_v25 }
 0x10d   : > { %1968 = vmatmul.mubr.msk.f32.vlgmr.msra.gmra.mxu1 %vm194_vm0, %v2244_v39  ;;  %1977 = vmatprep.subr.mxu1 %v1514_v26 }
 0x10e   : > { %1978 = vmatpush3.msra.mxu1 %v1514_v26  ;;  %1981 = vmatprep.mubr.msk.f32.mxu1 %vm194_vm0, %v2264_v0 }
 0x10f   : > { %1979 = vmatprep.subr.mxu1 %v1513_v27 }
 0x110   : > { %1980 = vmatpush3.msra.mxu1 %v1513_v27 }
 0x111   : > { %1982 = vmatmul.mubr.msk.f32.vlgmr.msra.gmra.mxu1 %vm194_vm0, %v2269_v3 }
 0x1a1   : > { %v1906_v28 = vpop.f32.mrf.mxu1 }
 0x1a3   : > { %v694_v29 = vpop.f32.mrf.mxu1 }
 0x1b2   : > { %v1913_v30 = vpop.f32.mrf.mxu1 }
 0x1b3   : > { %v868_v40 = vsub.f32 %v1906_v28, %v1913_v30 }
 0x1b4   : > { %v775_v31 = vpop.f32.mrf.mxu1 }
 0x1b5   : > { %v867_v44 = vsub.f32 %v694_v29, %v775_v31  ;;  %v870_v48 = vmul.f32 %v868_v40, %v868_v40 }
 0x1b7   : > { %v1920_v32 = vpop.f32.mrf.mxu1  ;;  %v869_v53 = vmul.f32 %v867_v44, %v867_v44 }
 0x1b8   : > { %v874_v33 = vsub.f32 %v1920_v32, %v1906_v28 }
 0x1b9   : > { %v858_v34 = vpop.f32.mrf.mxu1  ;;  %v1934_v35 = vpop.f32.mrf.mxu0 }
 0x1ba   : > { %v873_v36 = vsub.f32 %v858_v34, %v694_v29  ;;  %v876_v38 = vsub.f32 %v874_v33, %v1913_v30 }
 0x1bb   : > { %v1022_v37 = vpop.f32.mrf.mxu0 }
 0x1bc   : > { %v1927_v39 = vpop.f32.mrf.mxu1  ;;  %v875_v41 = vsub.f32 %v873_v36, %v775_v31  ;;  %v878_v45 = vmul.f32 %v876_v38, %v876_v38 }
 0x1bd   : > { %v1109_v46 = vsub.f32 %v1927_v39, %v1934_v35 }
 0x1be   : > { %v947_v42 = vpop.f32.mrf.mxu1  ;;  %v877_v49 = vmul.f32 %v875_v41, %v875_v41  ;;  %v880_v54 = vadd.f32 %v878_v45, %v870_v48 }
 0x1bf   : > { %v1948_v43 = vpop.f32.mrf.mxu0  ;;  %v1108_v50 = vsub.f32 %v947_v42, %v1022_v37  ;;  %v1111_v55 = vmul.f32 %v1109_v46, %v1109_v46 }
 0x1c0   : > { %v879_v60 = vadd.f32 %v877_v49, %v869_v53 }
 0x1c1   : > { %v1188_v47 = vpop.f32.mrf.mxu0  ;;  %v1110_v61 = vmul.f32 %v1108_v50, %v1108_v50  ;;  %v1113_v1 = vadd.f32 %v1111_v55, %v880_v54 }
 0x1c2   : > { %v1941_v51 = vpop.f32.mrf.mxu1 }
 0x1c3   : > { %v1115_v52 = vsub.f32 %v1941_v51, %v1927_v39  ;;  %v1112_v6 = vadd.f32 %v1110_v61, %v879_v60 }
 0x1c4   : > { %v1099_v56 = vpop.f32.mrf.mxu1 }
 0x1c5   : > { %v1117_v57 = vsub.f32 %v1115_v52, %v1934_v35  ;;  %v1114_v58 = vsub.f32 %v1099_v56, %v947_v42  ;;  %v1962_v59 = vpop.f32.mrf.mxu0 }
 0x1c6   : > { %v1356_v3 = vsub.f32 %v1962_v59, %v1948_v43 }
 0x1c7   : > { %v1119_v62 = vmul.f32 %v1117_v57, %v1117_v57  ;;  %v1116_v63 = vsub.f32 %v1114_v58, %v1022_v37  ;;  %v1340_v0 = vpop.f32.mrf.mxu0 }
 0x1c8   : > { %v1955_v2 = vpop.f32.mrf.mxu1  ;;  %v1355_v9 = vsub.f32 %v1340_v0, %v1188_v47 }
 0x1c9   : > { %v1118_v4 = vmul.f32 %v1116_v63, %v1116_v63  ;;  %v1350_v5 = vsub.f32 %v1948_v43, %v1955_v2  ;;  %v1121_v7 = vadd.f32 %v1119_v62, %v1113_v1  ;;  %v1358_v14 = vsub.f32 %v1356_v3, %v1955_v2 }
 0x1ca   : > { %v1263_v8 = vpop.f32.mrf.mxu1 }
 0x1cb   : > { %v1352_v10 = vmul.f32 %v1350_v5, %v1350_v5  ;;  %v1349_v11 = vsub.f32 %v1188_v47, %v1263_v8  ;;  %v1976_v12 = vpop.f32.mrf.mxu0  ;;  %v1120_v13 = vadd.f32 %v1118_v4, %v1112_v6  ;;  %v1357_v19 = vsub.f32 %v1355_v9, %v1263_v8 }
 0x1cc   : > { %v1360_v22 = vmul.f32 %v1358_v14, %v1358_v14 }
 0x1cd   : > { %v1351_v15 = vmul.f32 %v1349_v11, %v1349_v11  ;;  %v1969_v16 = vpop.f32.mrf.mxu1  ;;  %v1504_v17 = vpop.f32.mrf.mxu0  ;;  %v1354_v18 = vadd.f32 %v1352_v10, %v1121_v7  ;;  %v1359_v27 = vmul.f32 %v1357_v19, %v1357_v19 }
 0x1ce   : > { %v1591_v20 = vsub.f32 %v1969_v16, %v1976_v12 }
 0x1cf   : > { %v1429_v21 = vpop.f32.mrf.mxu1  ;;  %v1353_v23 = vadd.f32 %v1351_v15, %v1120_v13  ;;  %v1362_v26 = vadd.f32 %v1360_v22, %v1354_v18 }
 0x1d0   : > { %v1590_v24 = vsub.f32 %v1429_v21, %v1504_v17  ;;  %v1593_v28 = vmul.f32 %v1591_v20, %v1591_v20 }
 0x1d1   : > { %v1983_v25 = vpop.f32.mrf.mxu1  ;;  %v1361_v31 = vadd.f32 %v1359_v27, %v1353_v23 }
 0x1d2   : > { %v1597_v29 = vsub.f32 %v1983_v25, %v1969_v16  ;;  %v1592_v32 = vmul.f32 %v1590_v24, %v1590_v24  ;;  %v1595_v35 = vadd.f32 %v1593_v28, %v1362_v26 }
 0x1d3   : > { %v1581_v30 = vpop.f32.mrf.mxu1 }
 0x1d4   : > { %v1599_v33 = vsub.f32 %v1597_v29, %v1976_v12  ;;  %v1596_v34 = vsub.f32 %v1581_v30, %v1429_v21  ;;  %v1594_v38 = vadd.f32 %v1592_v32, %v1361_v31 }
 0x1d6   : > { %v1601_v36 = vmul.f32 %v1599_v33, %v1599_v33  ;;  %v1598_v37 = vsub.f32 %v1596_v34, %v1504_v17 }
 0x1d8   : > { %v1603_v39 = vadd.f32 %v1601_v36, %v1595_v35  ;;  %v1600_v40 = vmul.f32 %v1598_v37, %v1598_v37 }
 0x1da   : > { %2025 = vrsqrt.f32 %v1603_v39  ;;  %v1602_v41 = vadd.f32 %v1600_v40, %v1594_v38  ;;  %vm1613_vm1 = vcmp.eq.f32.partialorder %v1603_v39, inf  ;;  %v1616_v45 = vand.u32 2147483648, %v1603_v39 }
 0x1db   : > { %vm1615_vm2 = vcmp.eq.f32.partialorder %v1603_v39, 0.0 }
 0x1dc   : > { %2027 = vrsqrt.f32 %v1602_v41  ;;  %vm1606_vm3 = vcmp.eq.f32.partialorder %v1602_v41, inf  ;;  %v1609_v48 = vand.u32 2147483648, %v1602_v41  ;;  %vm1608_vm4 = vcmp.eq.f32.partialorder %v1602_v41, 0.0 }
 0x1e7   : > { %v2026_v42 = vpop.eup %2025 }
 0x1e8   : > { %v1612_v43 = vmul.f32 %v2026_v42, %v1603_v39 }
 0x1e9   : > { %v2028_v44 = vpop.eup %2027 }
 0x1ea   : > { %v1605_v46 = vmul.f32 %v2028_v44, %v1602_v41  ;;  %v1614_v47 = vsel %vm1613_vm1, %v1603_v39, %v1612_v43 }
 0x1eb   : > { %v1617_v49 = vsel %vm1615_vm2, %v1616_v45, %v1614_v47 }
 0x1ec   : > { %v1607_v50 = vsel %vm1606_vm3, %v1602_v41, %v1605_v46  ;;  %1619 = vst.msk [vmem:[%s163_s11 + $0x8] sm:$0xff] %vm194_vm0, %v1617_v49 }
 0x1ed   : > { %v1610_v51 = vsel %vm1608_vm4, %v1609_v48, %v1607_v50 }
 0x1ee   : > { %1618 = vst.msk [vmem:[%s163_s11] sm:$0xff] %vm194_vm0, %v1610_v51 }
 0x1ef   : > { %2042 = shalt.err (!%p2039_p3)
}
 0x1f0   : > { %s2043_s29 = scalar_lea.hbm %s2318_s24, 256  ;;  %s2047_s5 = scalar_lea.hbm %s2367_s3, 512 }
 0x1f1   : > { %p2044_p4 = scmp.ne.s32.totalorder %s2318_s24, %s2043_s29  ;;  %p2048_p9 = scmp.lt.s32.totalorder %s2318_s24, %s2367_s3 }
 0x1f2   : > { %p2049_p10 = scmp.lt.s32.totalorder %s2047_s5, %s2043_s29 }
 0x1f3   : > { %p2045_p7 = pnand %p2044_p4, %p2152_p5 }
 0x1f4   : > { %p2050_p11 = por %p2049_p10, %p2048_p9 }
 0x1f5   : > { %p2046_p8 = pneg %p2045_p7 }
 0x1f7   : > { %p2051_p12 = pnand %p2050_p11, %p2046_p8 }
 0x1f9   : > { %2054 = shalt.err (!%p2051_p12)
}
 0x1fa   : > { %s2092_s8 = smov 128   ;;  %s2093_s9 = smov 8  }
 0x1fb   : > { %1984 = dma.vmem_to_hbm [thread:$0]  (%p2152_p5), %s2320_s17, 256, %s2318_s24, %s2324_s16, %s2092_s8, %s2092_s8, %s2093_s9  }
 0x1fc PF: > { %p1990_p13 = scmp.ge.s32.totalorder %s2089_s15, 2  ;;  %s1649_s10 = sand.u32 1, %s2077_s12  }
 0x1fd   : > { %s1650_s11 = scalar_lea.sflag [#allocation3], %s1649_s10 }
 0x1fe   : > { %p1987_p0 = pnand %p1990_p13, %p2156_p6 }
 0x200   : > { %p1988_p1 = pneg %p1987_p0 }
 0x202   : > { %2072 = dma.done.wait (%p1988_p1), %s1650_s11, 256  }
 0x203   : > { %2074 = vsyncadd (%p1988_p1), %s1650_s11, 4294967040  ;;  %p13_p2 = scmp.ge.s32.totalorder %s2139_s18, 4   ;;  %s2370_s12 = smov %s2081_s13 }
 0x204   : > { %s2371_s13 = smov %s2085_s14  ;;  %s2372_s14 = smov %s2150_s21 }
 0x205   : > { %s2373_s15 = smov %s2139_s18  ;;  %15 = sbr.rel (!%p13_p2) target bundleno = 3 (0x3), region = 72 }
 0x20a   :  { %1655 = vsyncpa [#allocation3], 1 }
 0x20b   :  { %1657 = vsyncpa [#allocation3 + $0x1], 1 }

</bundles_post_ra>
